<compile_context>
chip_gen: v6e
topology: v6e:2x2x1
jax: 0.10.0
libtpu: 0.0.40
codegen_flags: <defaults>
</compile_context>

<pallas_src>
import jax
import jax.numpy as jnp
from jax.experimental import pallas as pl
from jax.experimental.pallas import tpu as pltpu

N = 2
IN_CH = 16
H = 16
W = 16
SE_RATIO = 0.25
DIVISOR = 4


def _make_divisible(v, divisor, min_value=None):
    if min_value is None:
        min_value = divisor
    new_v = max(min_value, int(v + divisor / 2) // divisor * divisor)
    if new_v < 0.9 * v:
        new_v += divisor
    return new_v


RED_CH = _make_divisible(IN_CH * SE_RATIO, DIVISOR)   # = 4


def se_kernel(x_ref, wr_ref, br_ref, we_ref, be_ref, o_ref):
    # x_ref:  (1, C, P)   one image, spatial flattened on the lane axis
    # wr_ref: (C, R)      conv_reduce weight, pre-transposed
    # br_ref: (1, R)      conv_reduce bias
    # we_ref: (C, R)      conv_expand weight (torch (C,R,1,1) flattened; no transpose)
    # be_ref: (C, 1)      conv_expand bias
    # o_ref:  (1, C, P)
    x = x_ref[0]                                       # (C, P)
    xf = x.astype(jnp.float32)                         # internal compute in f32 (v5e-safe)

    # AdaptiveAvgPool2d(1): global mean over the flattened spatial (lane) axis.
    pooled = jnp.mean(xf, axis=-1, keepdims=True)      # (C, 1), C on sublanes

    # conv_reduce (1x1 conv) + ReLU, on the VPU: broadcast-mul + sublane reduce.
    h = jnp.sum(pooled * wr_ref[...], axis=0, keepdims=True) + br_ref[...]   # (1, R)
    h = jnp.maximum(h, 0.0)

    # conv_expand (1x1 conv), on the VPU: broadcast-mul + lane reduce.
    # Result is (C, 1) -> already sublane-aligned with x, no relayout for the gate.
    s = jnp.sum(we_ref[...] * h, axis=-1, keepdims=True) + be_ref[...]       # (C, 1)

    # gate_fn = hard_sigmoid: relu6(s + 3) / 6.
    gate = jnp.clip(s + 3.0, 0.0, 6.0) * (1.0 / 6.0)   # (C, 1)

    # Scale the input by the per-channel gate; lane-dense full-block store.
    o_ref[0] = (xf * gate).astype(o_ref.dtype)


def prepare_se_params(w_reduce, b_reduce, w_expand, b_expand):
    """One-time (parameter-load time) repack of torch-layout conv weights."""
    r, c = w_reduce.shape[0], w_reduce.shape[1]
    wr = jnp.transpose(w_reduce.reshape(r, c))         # (C, R)
    we = w_expand.reshape(c, r)                        # (C, R)  -- no transpose needed
    br = b_reduce.reshape(1, r)                        # (1, R)
    be = b_expand.reshape(c, 1)                        # (C, 1)
    return wr, br, we, be


def squeeze_excite(x_nchw, wr, br, we, be):
    n, c, h, w = x_nchw.shape
    p = h * w
    # TODO(synk): if H*W is not a multiple of 128 at other sizes, pad the flattened
    # spatial axis before the kernel to keep stores lane-dense (unmasked vst).
    x_ncp = x_nchw.reshape(n, c, p)

    out = pl.pallas_call(
        se_kernel,
        out_shape=jax.ShapeDtypeStruct((n, c, p), x_nchw.dtype),
        grid=(n,),
        in_specs=[
            pl.BlockSpec((1, c, p), lambda i: (i, 0, 0)),   # per-image slab of x
            pl.BlockSpec(wr.shape, lambda i: (0, 0)),       # weights: grid-invariant
            pl.BlockSpec(br.shape, lambda i: (0, 0)),
            pl.BlockSpec(we.shape, lambda i: (0, 0)),
            pl.BlockSpec(be.shape, lambda i: (0, 0)),
        ],
        out_specs=pl.BlockSpec((1, c, p), lambda i: (i, 0, 0)),
        compiler_params=pltpu.CompilerParams(
            # Batch axis is embarrassingly parallel -> lets v7x shard across its
            # 2 TensorCores; harmless no-op on v5e/v6e.
            dimension_semantics=("parallel",),
        ),
    )(x_ncp, wr, br, we, be)
    return out.reshape(n, c, h, w)


def reference(x_nchw, w_reduce, b_reduce, w_expand, b_expand):
    # Pure-JAX reference mirroring the PyTorch forward (torch-layout weights).
    r = w_reduce.shape[0]
    c = x_nchw.shape[1]
    pooled = jnp.mean(x_nchw, axis=(2, 3))                                   # (N, C)
    hid = jnp.maximum(pooled @ w_reduce.reshape(r, c).T + b_reduce, 0.0)     # (N, R)
    s = hid @ w_expand.reshape(c, r).T + b_expand                            # (N, C)
    gate = jnp.clip(s + 3.0, 0.0, 6.0) * (1.0 / 6.0)
    return x_nchw * gate[:, :, None, None]


if __name__ == "__main__":
    key = jax.random.PRNGKey(0)
    kx, kwr, kbr, kwe, kbe = jax.random.split(key, 5)

    # PyTorch-shaped input (N, C, H, W).
    x = jax.random.normal(kx, (N, IN_CH, H, W), dtype=jnp.float32)

    # nn.Conv2d default init: U(-1/sqrt(fan_in), 1/sqrt(fan_in)), fan_in = in_ch * 1 * 1.
    s_r = 1.0 / (IN_CH ** 0.5)
    s_e = 1.0 / (RED_CH ** 0.5)
    w_reduce = jax.random.uniform(kwr, (RED_CH, IN_CH, 1, 1), jnp.float32, -s_r, s_r)
    b_reduce = jax.random.uniform(kbr, (RED_CH,), jnp.float32, -s_r, s_r)
    w_expand = jax.random.uniform(kwe, (IN_CH, RED_CH, 1, 1), jnp.float32, -s_e, s_e)
    b_expand = jax.random.uniform(kbe, (IN_CH,), jnp.float32, -s_e, s_e)

    # One-time parameter repack (hoisted out of the per-call path).
    wr, br, we, be = prepare_se_params(w_reduce, b_reduce, w_expand, b_expand)
    wr, br, we, be = jax.block_until_ready((wr, br, we, be))

    out = jax.block_until_ready(squeeze_excite(x, wr, br, we, be))
    ref = reference(x, w_reduce, b_reduce, w_expand, b_expand)

    assert out.shape == (N, IN_CH, H, W), out.shape
    assert jnp.allclose(out, ref, atol=1e-5, rtol=1e-5)
    print("KERNEL_OK")
</pallas_src>

<mosaic_0001>
module attributes {stable_mosaic.version = 11 : i64} {
  func.func @se_kernel(%arg0: i32, %arg1: memref<1x16x256xf32, #tpu.memory_space<vmem>>, %arg2: memref<16x4xf32, #tpu.memory_space<vmem>>, %arg3: memref<1x4xf32, #tpu.memory_space<vmem>>, %arg4: memref<16x4xf32, #tpu.memory_space<vmem>>, %arg5: memref<16x1xf32, #tpu.memory_space<vmem>>, %arg6: memref<1x16x256xf32, #tpu.memory_space<vmem>>) attributes {dimension_semantics = [#tpu.dimension_semantics<parallel>], iteration_bounds = array<i64: 2>, scalar_prefetch = 0 : i64, scratch_operands = 0 : i64, tpu.core_type = #tpu.core_type<tc>, window_params = [{transform_indices = @transform_0, window_bounds = array<i64: 1, 16, 256>}, {pipeline_mode = #tpu.pipeline_mode<synchronous>, transform_indices = @transform_1, window_bounds = array<i64: 16, 4>}, {pipeline_mode = #tpu.pipeline_mode<synchronous>, transform_indices = @transform_2, window_bounds = array<i64: 1, 4>}, {pipeline_mode = #tpu.pipeline_mode<synchronous>, transform_indices = @transform_3, window_bounds = array<i64: 16, 4>}, {pipeline_mode = #tpu.pipeline_mode<synchronous>, transform_indices = @transform_4, window_bounds = array<i64: 16, 1>}, {transform_indices = @transform_5, window_bounds = array<i64: 1, 16, 256>}]} {
    %c0 = arith.constant 0 : index
    %c0_0 = arith.constant 0 : index
    %c0_1 = arith.constant 0 : index
    %0 = vector.load %arg1[%c0, %c0_0, %c0_1] : memref<1x16x256xf32, #tpu.memory_space<vmem>>, vector<1x16x256xf32>
    %1 = vector.shape_cast %0 : vector<1x16x256xf32> to vector<16x256xf32>
    %cst = arith.constant dense<0.000000e+00> : vector<16xf32>
    %2 = vector.multi_reduction <add>, %1, %cst [1] : vector<16x256xf32> to vector<16xf32>
    %3 = vector.shape_cast %2 : vector<16xf32> to vector<16x1xf32>
    %cst_2 = arith.constant 2.560000e+02 : f32
    %4 = vector.broadcast %cst_2 : f32 to vector<16x1xf32>
    %5 = arith.divf %3, %4 : vector<16x1xf32>
    %c0_3 = arith.constant 0 : index
    %c0_4 = arith.constant 0 : index
    %6 = vector.load %arg2[%c0_3, %c0_4] : memref<16x4xf32, #tpu.memory_space<vmem>>, vector<16x4xf32>
    %7 = vector.broadcast %5 : vector<16x1xf32> to vector<16x4xf32>
    %8 = arith.mulf %7, %6 : vector<16x4xf32>
    %cst_5 = arith.constant dense<0.000000e+00> : vector<4xf32>
    %9 = vector.multi_reduction <add>, %8, %cst_5 [0] : vector<16x4xf32> to vector<4xf32>
    %10 = vector.shape_cast %9 : vector<4xf32> to vector<1x4xf32>
    %c0_6 = arith.constant 0 : index
    %c0_7 = arith.constant 0 : index
    %11 = vector.load %arg3[%c0_6, %c0_7] : memref<1x4xf32, #tpu.memory_space<vmem>>, vector<1x4xf32>
    %12 = arith.addf %10, %11 : vector<1x4xf32>
    %cst_8 = arith.constant 0.000000e+00 : f32
    %13 = vector.broadcast %cst_8 : f32 to vector<1x4xf32>
    %14 = arith.maximumf %12, %13 : vector<1x4xf32>
    %c0_9 = arith.constant 0 : index
    %c0_10 = arith.constant 0 : index
    %15 = vector.load %arg4[%c0_9, %c0_10] : memref<16x4xf32, #tpu.memory_space<vmem>>, vector<16x4xf32>
    %16 = vector.broadcast %14 : vector<1x4xf32> to vector<16x4xf32>
    %17 = arith.mulf %15, %16 : vector<16x4xf32>
    %cst_11 = arith.constant dense<0.000000e+00> : vector<16xf32>
    %18 = vector.multi_reduction <add>, %17, %cst_11 [1] : vector<16x4xf32> to vector<16xf32>
    %19 = vector.shape_cast %18 : vector<16xf32> to vector<16x1xf32>
    %c0_12 = arith.constant 0 : index
    %c0_13 = arith.constant 0 : index
    %20 = vector.load %arg5[%c0_12, %c0_13] : memref<16x1xf32, #tpu.memory_space<vmem>>, vector<16x1xf32>
    %21 = arith.addf %19, %20 : vector<16x1xf32>
    %cst_14 = arith.constant 3.000000e+00 : f32
    %22 = vector.broadcast %cst_14 : f32 to vector<16x1xf32>
    %23 = arith.addf %21, %22 : vector<16x1xf32>
    %cst_15 = arith.constant 0.000000e+00 : f32
    %cst_16 = arith.constant 6.000000e+00 : f32
    %24 = vector.broadcast %cst_15 : f32 to vector<16x1xf32>
    %25 = arith.maximumf %24, %23 : vector<16x1xf32>
    %26 = vector.broadcast %cst_16 : f32 to vector<16x1xf32>
    %27 = arith.minimumf %26, %25 : vector<16x1xf32>
    %cst_17 = arith.constant 0.166666672 : f32
    %28 = vector.broadcast %cst_17 : f32 to vector<16x1xf32>
    %29 = arith.mulf %27, %28 : vector<16x1xf32>
    %30 = vector.broadcast %29 : vector<16x1xf32> to vector<16x256xf32>
    %31 = arith.mulf %1, %30 : vector<16x256xf32>
    %c0_18 = arith.constant 0 : index
    %c0_19 = arith.constant 0 : index
    %c0_20 = arith.constant 0 : index
    %32 = vector.load %arg6[%c0_18, %c0_19, %c0_20] : memref<1x16x256xf32, #tpu.memory_space<vmem>>, vector<1x16x256xf32>
    %33 = vector.shape_cast %32 : vector<1x16x256xf32> to vector<16x256xf32>
    %34 = vector.shape_cast %31 : vector<16x256xf32> to vector<1x16x256xf32>
    tpu.vector_store %arg6[%c0_18, %c0_19, %c0_20], %34 {strides = array<i32>} : memref<1x16x256xf32, #tpu.memory_space<vmem>>, vector<1x16x256xf32>,
    return
  }
  func.func @transform_0(%arg0: i32) -> (i32, i32, i32) {
    %c0_i32 = arith.constant 0 : i32
    %c0_i32_0 = arith.constant 0 : i32
    %c0_i32_1 = arith.constant 0 : i32
    return %arg0, %c0_i32, %c0_i32_0 : i32, i32, i32
  }
  func.func @transform_1(%arg0: i32) -> (i32, i32) {
    %c0_i32 = arith.constant 0 : i32
    %c0_i32_0 = arith.constant 0 : i32
    %c0_i32_1 = arith.constant 0 : i32
    return %c0_i32, %c0_i32_0 : i32, i32
  }
  func.func @transform_2(%arg0: i32) -> (i32, i32) {
    %c0_i32 = arith.constant 0 : i32
    %c0_i32_0 = arith.constant 0 : i32
    %c0_i32_1 = arith.constant 0 : i32
    return %c0_i32, %c0_i32_0 : i32, i32
  }
  func.func @transform_3(%arg0: i32) -> (i32, i32) {
    %c0_i32 = arith.constant 0 : i32
    %c0_i32_0 = arith.constant 0 : i32
    %c0_i32_1 = arith.constant 0 : i32
    return %c0_i32, %c0_i32_0 : i32, i32
  }
  func.func @transform_4(%arg0: i32) -> (i32, i32) {
    %c0_i32 = arith.constant 0 : i32
    %c0_i32_0 = arith.constant 0 : i32
    %c0_i32_1 = arith.constant 0 : i32
    return %c0_i32, %c0_i32_0 : i32, i32
  }
  func.func @transform_5(%arg0: i32) -> (i32, i32, i32) {
    %c0_i32 = arith.constant 0 : i32
    %c0_i32_0 = arith.constant 0 : i32
    %c0_i32_1 = arith.constant 0 : i32
    return %arg0, %c0_i32, %c0_i32_0 : i32, i32, i32
  }
}

</mosaic_0001>

<bundles_post_ra>
// kernel: tpu_custom_call.1
= control target key start
LH: loop header
LB: loop body
LE: loop exit
PB: predicated region body
PF: predicated region fallthrough
CT: control target
= control target key end

     0   :  { %10 = vsyncpa [#allocation3], 0  ;;  %s803_s0 = inlined_call_operand.hbm [shape: f32[2,16,256], index: 0, kind: input, shape index: {}]   ;;  %s804_s1 = inlined_call_operand.vmem [shape: f32[16,4], index: 1, kind: input, shape index: {}]   ;;  %s805_s2 = inlined_call_operand.vmem [shape: f32[1,4], index: 2, kind: input, shape index: {}]   ;;  %s806_s3 = inlined_call_operand.vmem [shape: f32[16,4], index: 3, kind: input, shape index: {}]   ;;  %s807_s4 = inlined_call_operand.vmem [shape: f32[16,1], index: 4, kind: input, shape index: {}]   ;;  %s808_s5 = inlined_call_operand.hbm [shape: f32[2,16,256], index: 5, kind: output, shape index: {}]  }
   0x1   :  { %12 = vsyncpa [#allocation3 + $0x1], 0 }
   0x2   :  { %13 = vsyncpa [#allocation4], 0 }
   0x3   :  { %15 = vsyncpa [#allocation4 + $0x1], 0  ;;  %s604_s18 = smov 0   ;;  %s606_s19 = smov 0  }
   0x4   :  { %s608_s20 = smov 0   ;;  %s610_s21 = smov 0  }
   0x5 LB: > { %s625_s22 = sadd.s32 4294967295, %s565_s21   ;;  %s404_s23 = sadd.s32 4294967294, %s565_s21   ;;  %s565_s21 = sphi %s610_s21, %s823_s21   ;;  %s561_s20 = sphi %s608_s20, %s822_s20   ;;  %s557_s19 = sphi %s606_s19, %s821_s19   ;;  %s553_s18 = sphi %s604_s18, %s820_s18  }
   0x6   : > { %s629_s24 = sadd.s32 1, %s565_s21   ;;  %s28_s25 = sadd.s32 1, %s561_s20 }
   0x7   : > { %s25_s26 = ssub.s32 %s565_s21, %s629_s24  ;;  %p35_p0 = scmp.ne.s32.totalorder %s561_s20, %s557_s19 }
   0x8   : > { %p26_p1 = scmp.eq.s32.totalorder %s25_s26, 0  ;;  %p36_p2 = scmp.eq.s32.totalorder %s565_s21, 0 }
   0x9   : > { %p41_p3 = scmp.ne.s32.totalorder %s557_s19, %s553_s18  ;;  %p42_p4 = scmp.eq.s32.totalorder %s625_s22, 0 }
   0xa   : > { %s641_s27 = scalar_select %p26_p1, %s561_s20, %s28_s25  }
   0xb   : > { %p643_p5 = por %p36_p2, %p35_p0  ;;  %p647_p6 = por %p42_p4, %p41_p3 }
   0xc   : > { %p149_p7 = scmp.eq.s32.totalorder %s625_s22, 1  ;;  %p155_p8 = scmp.eq.s32.totalorder %s404_s23, 1 }
   0xd   : > { %s812_s29 = scalar_select %p647_p6, 1, 0 }
   0xe   : > { %p432_p10 = scmp.lt.s32.totalorder %s565_s21, 2  ;;  %p654_p11 = por %p149_p7, %p35_p0 }
   0xf   : > { %p658_p12 = por %p155_p8, %p41_p3  ;;  %s187_s7 = sand.u32 1, %s561_s20  }
  0x10   : > { %s813_s30 = scalar_select %p654_p11, 1, 0 }
  0x11   : > { %s814_s6 = scalar_select %p658_p12, 1, 0 }
  0x12   : > { %s418_s8 = sshll.u32 %s565_s21, 9  ;;  %s407_s9 = sshll.u32 %s187_s7, 5 }
  0x13   : > { %s667_s12 = scalar_lea.hbm %s803_s0, %s418_s8  ;;  %s191_s13 = scalar_lea.vmem [#allocation2], %s407_s9 }
  0x14   : > { %s198_s14 = sshll.u32 %s191_s13, 4  ;;  %p671_p13 = pnand %p432_p10, %p643_p5  ;;  %s675_s14 = int_to_ptr.vmem [resolvable:$true] %s198_s14 }
  0x15   : > { %s677_s16 = scalar_lea.sflag [#allocation3], %s187_s7  ;;  %s473_s17 = scalar_lea.hbm %s667_s12, 512 }
  0x16   : > { %p474_p0 = scmp.ne.s32.totalorder %s667_s12, %s473_s17  ;;  %p475_p1 = pneg %p671_p13 }
  0x17   : > { %s478_s26 = scalar_lea.hbm %s803_s0, 1024  ;;  %p479_p4 = scmp.lt.s32.totalorder %s667_s12, %s803_s0 }
  0x18   : > { %p476_p2 = pnand %p475_p1, %p474_p0  ;;  %p480_p5 = scmp.lt.s32.totalorder %s478_s26, %s473_s17 }
  0x1a   : > { %p477_p3 = pneg %p476_p2  ;;  %p481_p7 = por %p480_p5, %p479_p4 }
  0x1c   : > { %p482_p8 = pnand %p481_p7, %p477_p3 }
  0x1e   : > { %485 = shalt.err (!%p482_p8)
}
  0x1f   : > { %s486_s7 = scalar_lea.vmem %s675_s14, 512  ;;  %s567_s9 = smov [#allocation2]  }
  0x20   : > { %p487_p10 = scmp.ne.s32.totalorder %s675_s14, %s486_s7  ;;  %s491_s10 = sshll.u32 %s567_s9, 4  ;;  %s492_s10 = int_to_ptr.vmem [resolvable:$false] %s491_s10 }
  0x21   : > { %s493_s11 = scalar_lea.vmem %s492_s10, 1024  ;;  %p494_p2 = scmp.lt.s32.totalorder %s675_s14, %s492_s10 }
  0x22   : > { %p489_p9 = pnand %p487_p10, %p475_p1  ;;  %p495_p12 = scmp.lt.s32.totalorder %s493_s11, %s486_s7 }
  0x24   : > { %p490_p0 = pneg %p489_p9  ;;  %p496_p11 = por %p495_p12, %p494_p2 }
  0x26   : > { %p497_p6 = pnand %p496_p11, %p490_p0 }
  0x28   : > { %500 = shalt.err (!%p497_p6)
}
  0x29   : > { %s568_s13 = smov 256   ;;  %s569_s17 = smov 16  }
  0x2a   : > { %427 = dma.hbm_to_vmem [thread:$0]  (!%p671_p13), %s667_s12, 512, %s675_s14, %s677_s16, %s568_s13, %s568_s13, %s569_s17  }
  0x2b   : > { %p410_p9 = scmp.ge.s32.totalorder %s565_s21, 1  ;;  %p206_p1 = scmp.lt.s32.totalorder %s565_s21, 3 }
  0x2d   : > { %p207_p3 = pnand %p410_p9, %p206_p1 }
  0x2e   : > { %s701_s23 = sand.u32 (!%p207_p3), 1, %s557_s19   ;;  %p816_p6 = scmp.ne.s32.totalorder (!%p207_p3), %s812_s29, 0 }
  0x2f   : > { %210 = sbr.rel (%p207_p3) target bundleno = 518 (0x206), region = 40  ;;  %s411_s25 = sshll.u32 (!%p207_p3), %s701_s23, 5 }
  0x30   : > { %s213_s26 = scalar_lea.sflag (!%p207_p3), [#allocation3], %s701_s23  ;;  %s216_s28 = scalar_lea.vmem (!%p207_p3), [#allocation2], %s411_s25 }
  0x34   : > { %544 = dma.done.wait (%p816_p6), %s213_s26, 512  }
  0x35   : > { %546 = vsyncadd (%p816_p6), %s213_s26, 4294966784  ;;  %v711_v0 = vld [vmem:[%s216_s28] sm:$0xff]  ;;  %v713_v1 = vld [vmem:[%s216_s28 + $0x8] sm:$0xff]  ;;  %vm260_vm0 = vcmask 31744   ;;  %v275_v20 = vlaneseq  ;;  %v570_v36 = vmov 0   ;;  %s242_s29 = scalar_lea.vmem [#allocation5], %s411_s25 }
  0x36   : > { %v715_v2 = vld [vmem:[%s216_s28 + $0x10] sm:$0xff]  ;;  %v247_v3 = vadd.f32 %v713_v1, %v711_v0  ;;  %v719_v4 = vld [vmem:[%s216_s28 + $0x18] sm:$0xff]  ;;  %v256_v8 = vld [vmem:[%s804_s1] sm:$0xff]  ;;  %471 = vset.pattern.permute.xlu0 %v570_v36  ;;  %472 = vset.pattern.permute.xlu1 %v570_v36  ;;  %s331_s12 = sshll.u32 %s242_s29, 4  ;;  %s419_s14 = sshll.u32 %s625_s22, 9  ;;  %s753_s12 = int_to_ptr.vmem [resolvable:$true] %s331_s12 }
  0x37   : > { %v250_v5 = vadd.f32 %v719_v4, %v715_v2  ;;  %v257_v9 = vld [vmem:[%s804_s1 + $0x8] sm:$0xff]  ;;  %v276_v23 = vshrl.u32 %v275_v20, 7  ;;  %v270_v24 = vld [vmem:[%s805_s2] sm:$0x1]  ;;  %s758_s25 = scalar_lea.hbm %s808_s5, %s419_s14  ;;  %s318_s22 = scalar_lea.sflag [#allocation4], %s701_s23 }
  0x38   : > { %248 = vadd.xlane.f32.xlu0 %v247_v3  ;;  %v273_v29 = vld [vmem:[%s806_s3] sm:$0xff]  ;;  %v274_v31 = vld [vmem:[%s806_s3 + $0x8] sm:$0xff]  ;;  %s501_s8 = scalar_lea.vmem %s753_s12, 512  ;;  %p817_p12 = scmp.ne.s32.totalorder %s813_s30, 0 }
  0x39   : > { %v277_v27 = vsub.s32 0, %v276_v23  ;;  %v287_v37 = vld [vmem:[%s807_s4] sm:$0xff]  ;;  %v288_v40 = vld [vmem:[%s807_s4 + $0x8] sm:$0xff]  ;;  %p502_p11 = scmp.ne.s32.totalorder %s753_s12, %s501_s8  ;;  %s571_s7 = smov [#allocation5]  }
  0x3a   : > { %s505_s9 = sshll.u32 %s571_s7, 4  ;;  %s506_s9 = int_to_ptr.vmem [resolvable:$false] %s505_s9 }
  0x3b   : > { %p503_p13 = pnand %p502_p11, %p817_p12  ;;  %s507_s10 = scalar_lea.vmem %s506_s9, 1024 }
  0x3c   : > { %251 = vadd.xlane.f32.xlu0 %v250_v5  ;;  %p508_p5 = scmp.lt.s32.totalorder %s753_s12, %s506_s9  ;;  %p509_p7 = scmp.lt.s32.totalorder %s507_s10, %s501_s8 }
  0x3d   : > { %p504_p4 = pneg %p503_p13 }
  0x3e   : > { %p510_p8 = por %p509_p7, %p508_p5 }
  0x40   : > { %p511_p10 = pnand %p510_p8, %p504_p4 }
  0xc1   : > { %v249_v6 = vpop.xlane.xlu0 %248 }
  0xc2   : > { %v254_v7 = vmul.f32 0.00390625, %v249_v6 }
  0xc4   : > { %v258_v11 = vmul.f32 %v256_v8, %v254_v7 }
  0xc5   : > { %v252_v10 = vpop.xlane.xlu0 %251 }
  0xc6   : > { %v255_v12 = vmul.f32 0.00390625, %v252_v10  ;;  %v261_v14 = vsel %vm260_vm0, %v258_v11, 0.0 }
  0xc8   : > { %v259_v13 = vmul.f32 %v257_v9, %v255_v12 }
  0xca   : > { %v262_v15 = vsel %vm260_vm0, %v259_v13, 0.0 }
  0xcb   : > { %v263_v16 = vadd.f32 %v262_v15, %v261_v14 }
  0xcd   : > { %v264_v17 = vrot.slane %v263_v16, 4 }
  0xcf   : > { %v265_v18 = vadd.f32 %v264_v17, %v263_v16 }
  0xd1   : > { %v266_v19 = vrot.slane %v265_v18, 2 }
  0xd3   : > { %v267_v21 = vadd.f32 %v266_v19, %v265_v18 }
  0xd5   : > { %v268_v22 = vrot.slane %v267_v21, 1 }
  0xd7   : > { %v269_v25 = vadd.f32 %v268_v22, %v267_v21 }
  0xd9   : > { %v271_v26 = vadd.f32 %v270_v24, %v269_v25 }
  0xdb   : > { %v272_v28 = vmax.f32 %v271_v26, 0.0 }
  0xdd   : > { %v278_v30 = vrot.slane %v272_v28, %v277_v27 }
  0xdf   : > { %v279_v32 = vmul.f32 %v278_v30, %v273_v29  ;;  %v280_v34 = vmul.f32 %v278_v30, %v274_v31 }
  0xe1   : > { %v281_v33 = vsel %vm260_vm0, %v279_v32, 0.0  ;;  %v284_v35 = vsel %vm260_vm0, %v280_v34, 0.0 }
  0xe2   : > { %282 = vadd.xlane.f32.xlu1 %v281_v33 }
  0xe6   : > { %285 = vadd.xlane.f32.xlu1 %v284_v35 }
 0x16b   : > { %v283_v38 = vpop.xlane.xlu1 %282 }
 0x16c   : > { %v289_v39 = vadd.f32 %v287_v37, %v283_v38 }
 0x16e   : > { %v291_v41 = vadd.f32 3.0, %v289_v39 }
 0x16f   : > { %v286_v42 = vpop.xlane.xlu1 %285 }
 0x170   : > { %v293_v43 = vmax.f32 %v291_v41, 0.0  ;;  %v290_v44 = vadd.f32 %v288_v40, %v286_v42 }
 0x172   : > { %v295_v45 = vmin.f32 %v293_v43, 6.0  ;;  %v292_v46 = vadd.f32 3.0, %v290_v44 }
 0x174   : > { %v297_v47 = vmul.f32 0.16666667, %v295_v45  ;;  %v294_v48 = vmax.f32 %v292_v46, 0.0 }
 0x176   : > { %v296_v49 = vmin.f32 %v294_v48, 6.0  ;;  %301 = vperm.xlu0 %471, %v297_v47  }
 0x178   : > { %v298_v50 = vmul.f32 0.16666667, %v296_v49 }
 0x17a   : > { %306 = vperm.xlu1 %472, %v298_v50  }
 0x1f1   : > { %v302_v51 = vpop.permute.xlu0 %301 }
 0x1f2   : > { %v309_v52 = vmul.f32 %v302_v51, %v711_v0  ;;  %v310_v53 = vmul.f32 %v302_v51, %v713_v1 }
 0x1f4   : > { %313 = vst [vmem:[%s242_s29] sm:$0xff] %v309_v52  ;;  %314 = vst [vmem:[%s242_s29 + $0x8] sm:$0xff] %v310_v53 }
 0x1f5   : > { %v307_v54 = vpop.permute.xlu1 %306 }
 0x1f6   : > { %v311_v55 = vmul.f32 %v307_v54, %v715_v2  ;;  %v312_v56 = vmul.f32 %v307_v54, %v719_v4 }
 0x1f8   : > { %315 = vst [vmem:[%s242_s29 + $0x10] sm:$0xff] %v311_v55  ;;  %316 = vst [vmem:[%s242_s29 + $0x18] sm:$0xff] %v312_v56 }
 0x1f9   : > { %514 = shalt.err (!%p511_p10)
}
 0x1fa   : > { %s515_s11 = scalar_lea.hbm %s758_s25, 512  ;;  %s519_s26 = scalar_lea.hbm %s808_s5, 1024 }
 0x1fb   : > { %p516_p0 = scmp.ne.s32.totalorder %s758_s25, %s515_s11  ;;  %p520_p1 = scmp.lt.s32.totalorder %s758_s25, %s808_s5 }
 0x1fc   : > { %p521_p3 = scmp.lt.s32.totalorder %s519_s26, %s515_s11 }
 0x1fd   : > { %p517_p2 = pnand %p516_p0, %p817_p12 }
 0x1fe   : > { %p522_p6 = por %p521_p3, %p520_p1 }
 0x1ff   : > { %p518_p9 = pneg %p517_p2 }
 0x201   : > { %p523_p11 = pnand %p522_p6, %p518_p9 }
 0x203   : > { %526 = shalt.err (!%p523_p11)
}
 0x204   : > { %s572_s14 = smov 256   ;;  %s573_s15 = smov 16  }
 0x205   : > { %422 = dma.vmem_to_hbm [thread:$0]  (%p817_p12), %s753_s12, 512, %s758_s25, %s318_s22, %s572_s14, %s572_s14, %s573_s15  }
 0x206 PF: > { %s346_s16 = sand.u32 1, %s553_s18   ;;  %p818_p13 = scmp.ne.s32.totalorder %s814_s6, 0 }
 0x207   : > { %p819_p4 = scmp.ge.s32.totalorder %s565_s21, 2  ;;  %s347_s8 = scalar_lea.sflag [#allocation4], %s346_s16 }
 0x209   : > { %p429_p5 = pnand %p819_p4, %p818_p13 }
 0x20b   : > { %p430_p7 = pneg %p429_p5 }
 0x20d   : > { %548 = dma.done.wait (%p430_p7), %s347_s8, 512  }
 0x20e   : > { %550 = vsyncadd (%p430_p7), %s347_s8, 4294966784  ;;  %p18_p8 = scmp.ge.s32.totalorder %s629_s24, 4   ;;  %s820_s18 = smov %s557_s19 }
 0x20f   : > { %s821_s19 = smov %s561_s20  ;;  %s822_s20 = smov %s641_s27 }
 0x210   : > { %s823_s21 = smov %s629_s24  ;;  %20 = sbr.rel (!%p18_p8) target bundleno = 5 (0x5), region = 85 }
 0x215   :  { %352 = vsyncpa [#allocation3], 1 }
 0x216   :  { %354 = vsyncpa [#allocation3 + $0x1], 1 }
 0x217   :  { %355 = vsyncpa [#allocation4], 1 }
 0x218   :  { %357 = vsyncpa [#allocation4 + $0x1], 1 }

</bundles_post_ra>
